<compile_context>
chip_gen: v7x
topology: tpu7x:2x2x1
jax: 0.10.0
libtpu: 0.0.40
codegen_flags: <defaults>
</compile_context>

<pallas_src>
import jax
import jax.numpy as jnp
import numpy as np
from jax import lax
from jax.experimental import pallas as pl
from jax.experimental.pallas import tpu as pltpu

EPS = 1e-6

LANES = 512            # lane-slab width (multiple of 128)
CHUNK_ROWS = 8         # rows per inner-loop chunk -> (8, 512) temps = 4 vregs each
MAX_BLOCK_ROWS = 128   # rows per grid step -> 64K points ~= 1 MiB HBM traffic / step


def _cdiv(a, b):
    return -(-a // b)


def _round_up(a, b):
    return _cdiv(a, b) * b


def _lidar2camera_kernel(cam_ref, pts_ref, valid_ref):
    # cam_ref   : (24,) SMEM  [R_row2(3), t2, M(9 row-major), kz(3), b(3),
    #                          bbox(4: x_min, y_min, x_max, y_max), eps]
    # pts_ref   : (3, R_blk, LANES) VMEM  SoA slabs (x / y / z planes)
    # valid_ref : (R_blk, LANES)    VMEM  validity (0.0 / 1.0)
    r20, r21, r22, t2 = cam_ref[0], cam_ref[1], cam_ref[2], cam_ref[3]
    m00, m01, m02 = cam_ref[4], cam_ref[5], cam_ref[6]
    m10, m11, m12 = cam_ref[7], cam_ref[8], cam_ref[9]
    m20, m21, m22 = cam_ref[10], cam_ref[11], cam_ref[12]
    kz0, kz1, kz2 = cam_ref[13], cam_ref[14], cam_ref[15]
    b0, b1, b2 = cam_ref[16], cam_ref[17], cam_ref[18]
    x_min, y_min = cam_ref[19], cam_ref[20]
    x_max, y_max = cam_ref[21], cam_ref[22]
    eps = cam_ref[23]

    n_chunks = valid_ref.shape[0] // CHUNK_ROWS   # static (block shape is static)

    def chunk(c, carry):
        r0 = pl.multiple_of(c * CHUNK_ROWS, CHUNK_ROWS)
        rsl = pl.ds(r0, CHUNK_ROWS)
        x = pts_ref[0, rsl, :]                    # (CHUNK_ROWS, LANES)
        y = pts_ref[1, rsl, :]
        z = pts_ref[2, rsl, :]

        # camera-z, clamped (only the z row of R/T is needed unfolded).
        zc = jnp.maximum(r20 * x + r21 * y + r22 * z + t2, eps)

        # homogeneous projection with K pre-folded: h = M @ p + kz*zc + b
        hx = m00 * x + m01 * y + m02 * z + kz0 * zc + b0
        hy = m10 * x + m11 * y + m12 * z + kz1 * zc + b1
        hz = m20 * x + m21 * y + m22 * z + kz2 * zc + b2

        # Divide-free bbox test: px >= x_min  <=>  sgn(hz)*hx >= x_min*|hz|,
        # etc.  Sign guard keeps it correct for arbitrary projection matrices
        # (standard pinhole K gives hz = clamped z >= eps > 0 anyway).
        pos = hz >= 0.0
        ax = jnp.where(pos, hx, -hx)
        ay = jnp.where(pos, hy, -hy)
        az = jnp.abs(hz)
        mask = ((ax >= x_min * az) & (ax <= x_max * az) &
                (ay >= y_min * az) & (ay <= y_max * az))
        valid_ref[rsl, :] = mask.astype(jnp.float32)
        return carry

    lax.fori_loop(0, n_chunks, chunk, None, unroll=True)


def lidar2camera(points, bbox, K, R, T, *, eps=EPS):
    """points: (N, 3), bbox: (4,), K/R: (3, 3), T: (3, 1) -> (N, 4) float32."""
    points = points.astype(jnp.float32)
    n = points.shape[0]

    K = K.astype(jnp.float32)
    R = R.astype(jnp.float32)
    Tv = T.astype(jnp.float32).reshape(3)

    # Fold K into (R, T) on the host; the depth clamp only touches camera-z,
    # so:  h = M @ p + kz * max(R[2] @ p + t2, eps) + b
    M = K[:, :2] @ R[:2, :]              # (3, 3)
    b = K[:, :2] @ Tv[:2]                # (3,)
    kz = K[:, 2]                         # (3,)
    cam = jnp.concatenate([
        R[2, :], Tv[2:3],                              # 3 + 1
        M.reshape(-1), kz, b,                          # 9 + 3 + 3
        bbox.astype(jnp.float32).reshape(-1),          # 4
        jnp.array([eps], dtype=jnp.float32),           # 1
    ])                                                 # (24,)

    # Grid sizing: lane-pad to LANES, then split the row count evenly over
    # grid steps of <= MAX_BLOCK_ROWS rows (rounded to CHUNK_ROWS).  Padding
    # waste is O(steps * CHUNK_ROWS * LANES) points, never a full tile.
    rows0 = max(1, _cdiv(n, LANES))
    num_steps = _cdiv(rows0, MAX_BLOCK_ROWS)
    if num_steps > 1 and num_steps % 2 == 1:
        num_steps += 1                   # even split keeps both v7x TCs busy
    blk_rows = _round_up(_cdiv(rows0, num_steps), CHUNK_ROWS)
    rows = num_steps * blk_rows
    n_pad = rows * LANES

    pts = points
    if n_pad != n:
        pts = jnp.pad(points, ((0, n_pad - n), (0, 0)))
    # Single AoS->SoA copy (pad + transpose fuse in XLA; the reshape is free).
    pts_slab = pts.T.reshape(3, rows, LANES)

    validity = pl.pallas_call(
        _lidar2camera_kernel,
        out_shape=jax.ShapeDtypeStruct((rows, LANES), jnp.float32),
        grid_spec=pltpu.PrefetchScalarGridSpec(
            num_scalar_prefetch=0,
            grid=(num_steps,),
            in_specs=[
                pl.BlockSpec(memory_space=pltpu.MemorySpace.SMEM),        # cam scalars
                pl.BlockSpec((3, blk_rows, LANES), lambda i: (0, i, 0)),  # xyz slabs
            ],
            out_specs=pl.BlockSpec((blk_rows, LANES), lambda i: (i, 0)),  # validity
        ),
        compiler_params=pltpu.CompilerParams(
            dimension_semantics=("parallel",)),
    )(cam, pts_slab)

    # Module contract: output = concat([validity, points], dim=1) (AoS).
    # TODO(synk): callers that can consume SoA (mask kept separate) would skip
    # this final concatenate pass entirely.
    return jnp.concatenate([validity.reshape(-1)[:n, None], points], axis=1)


def _reference(points, bbox, K, R, T, eps=EPS):
    points = points.astype(jnp.float32)
    pcc = points @ R.T + T.T
    depth = jnp.clip(pcc[:, 2:3], min=eps)
    pcc = jnp.concatenate([pcc[:, :2], depth], axis=1)
    hom = pcc @ K.T
    p2d = hom[:, :2] / hom[:, 2:3]
    mask = ((p2d[:, 0] >= bbox[0]) & (p2d[:, 0] <= bbox[2]) &
            (p2d[:, 1] >= bbox[1]) & (p2d[:, 1] <= bbox[3]))
    return jnp.concatenate([mask.astype(jnp.float32)[:, None], points], axis=1)


if __name__ == "__main__":
    key = jax.random.PRNGKey(0)

    width, height = 64.0, 48.0
    # Deterministic camera parameters (shapes per module __init__):
    #   K: (3, 3) intrinsics, R: (3, 3) rotation, T: (3, 1) translation.
    K = jnp.array([[100.0, 0.0, width / 2.0],
                   [0.0, 100.0, height / 2.0],
                   [0.0, 0.0, 1.0]], dtype=jnp.float32)
    R = jnp.eye(3, dtype=jnp.float32)
    T = jnp.array([[0.1], [-0.2], [0.5]], dtype=jnp.float32)
    bbox = jnp.array([10.0, 10.0, 50.0, 40.0], dtype=jnp.float32)

    # Small N (single grid step, heavy lane padding) and a larger N that
    # exercises the balanced multi-step grid (4 steps of 104 rows).
    for n in (300, 200_000):
        kp, key = jax.random.split(key)
        points = jax.random.uniform(kp, (n, 3), jnp.float32, minval=-2.0, maxval=2.0)
        points = points.at[:, 2].add(3.0)   # roughly in front of the camera

        out = jax.block_until_ready(lidar2camera(points, bbox, K, R, T))
        ref = _reference(points, bbox, K, R, T)
        np.testing.assert_allclose(np.asarray(out), np.asarray(ref),
                                   rtol=1e-5, atol=1e-5)

    # TODO(synk): the PyTorch forward's debug print() calls are intentionally
    # not replicated inside the kernel.
    print("KERNEL_OK")
</pallas_src>

<mosaic_0001>
module attributes {stable_mosaic.version = 11 : i64} {
  func.func @_lidar2camera_kernel(%arg0: i32, %arg1: memref<24xf32, #tpu.memory_space<smem>>, %arg2: memref<3x8x512xf32, #tpu.memory_space<vmem>>, %arg3: memref<8x512xf32, #tpu.memory_space<vmem>>) attributes {dimension_semantics = [#tpu.dimension_semantics<parallel>], iteration_bounds = array<i64: 1>, scalar_prefetch = 0 : i64, scratch_operands = 0 : i64, tpu.core_type = #tpu.core_type<tc>, window_params = [{transform_indices = @transform_0, window_bounds = array<i64: 24>}, {transform_indices = @transform_1, window_bounds = array<i64: 3, 8, 512>}, {transform_indices = @transform_2, window_bounds = array<i64: 8, 512>}]} {
    %c0 = arith.constant 0 : index
    %0 = memref.load %arg1[%c0] : memref<24xf32, #tpu.memory_space<smem>>
    %c1 = arith.constant 1 : index
    %1 = memref.load %arg1[%c1] : memref<24xf32, #tpu.memory_space<smem>>
    %c2 = arith.constant 2 : index
    %2 = memref.load %arg1[%c2] : memref<24xf32, #tpu.memory_space<smem>>
    %c3 = arith.constant 3 : index
    %3 = memref.load %arg1[%c3] : memref<24xf32, #tpu.memory_space<smem>>
    %c4 = arith.constant 4 : index
    %4 = memref.load %arg1[%c4] : memref<24xf32, #tpu.memory_space<smem>>
    %c5 = arith.constant 5 : index
    %5 = memref.load %arg1[%c5] : memref<24xf32, #tpu.memory_space<smem>>
    %c6 = arith.constant 6 : index
    %6 = memref.load %arg1[%c6] : memref<24xf32, #tpu.memory_space<smem>>
    %c7 = arith.constant 7 : index
    %7 = memref.load %arg1[%c7] : memref<24xf32, #tpu.memory_space<smem>>
    %c8 = arith.constant 8 : index
    %8 = memref.load %arg1[%c8] : memref<24xf32, #tpu.memory_space<smem>>
    %c9 = arith.constant 9 : index
    %9 = memref.load %arg1[%c9] : memref<24xf32, #tpu.memory_space<smem>>
    %c10 = arith.constant 10 : index
    %10 = memref.load %arg1[%c10] : memref<24xf32, #tpu.memory_space<smem>>
    %c11 = arith.constant 11 : index
    %11 = memref.load %arg1[%c11] : memref<24xf32, #tpu.memory_space<smem>>
    %c12 = arith.constant 12 : index
    %12 = memref.load %arg1[%c12] : memref<24xf32, #tpu.memory_space<smem>>
    %c13 = arith.constant 13 : index
    %13 = memref.load %arg1[%c13] : memref<24xf32, #tpu.memory_space<smem>>
    %c14 = arith.constant 14 : index
    %14 = memref.load %arg1[%c14] : memref<24xf32, #tpu.memory_space<smem>>
    %c15 = arith.constant 15 : index
    %15 = memref.load %arg1[%c15] : memref<24xf32, #tpu.memory_space<smem>>
    %c16 = arith.constant 16 : index
    %16 = memref.load %arg1[%c16] : memref<24xf32, #tpu.memory_space<smem>>
    %c17 = arith.constant 17 : index
    %17 = memref.load %arg1[%c17] : memref<24xf32, #tpu.memory_space<smem>>
    %c18 = arith.constant 18 : index
    %18 = memref.load %arg1[%c18] : memref<24xf32, #tpu.memory_space<smem>>
    %c19 = arith.constant 19 : index
    %19 = memref.load %arg1[%c19] : memref<24xf32, #tpu.memory_space<smem>>
    %c20 = arith.constant 20 : index
    %20 = memref.load %arg1[%c20] : memref<24xf32, #tpu.memory_space<smem>>
    %c21 = arith.constant 21 : index
    %21 = memref.load %arg1[%c21] : memref<24xf32, #tpu.memory_space<smem>>
    %c22 = arith.constant 22 : index
    %22 = memref.load %arg1[%c22] : memref<24xf32, #tpu.memory_space<smem>>
    %c23 = arith.constant 23 : index
    %23 = memref.load %arg1[%c23] : memref<24xf32, #tpu.memory_space<smem>>
    %c0_i32 = arith.constant 0 : i32
    %c8_i32 = arith.constant 8 : i32
    %24 = arith.muli %c0_i32, %c8_i32 : i32
    %25 = tpu.assume_multiple %24, 8 : i32
    %c0_0 = arith.constant 0 : index
    %26 = arith.index_cast %25 : i32 to index
    %c0_1 = arith.constant 0 : index
    %27 = vector.load %arg2[%c0_0, %26, %c0_1] : memref<3x8x512xf32, #tpu.memory_space<vmem>>, vector<1x8x512xf32>
    %28 = vector.shape_cast %27 : vector<1x8x512xf32> to vector<8x512xf32>
    %c1_2 = arith.constant 1 : index
    %29 = arith.index_cast %25 : i32 to index
    %c0_3 = arith.constant 0 : index
    %30 = vector.load %arg2[%c1_2, %29, %c0_3] : memref<3x8x512xf32, #tpu.memory_space<vmem>>, vector<1x8x512xf32>
    %31 = vector.shape_cast %30 : vector<1x8x512xf32> to vector<8x512xf32>
    %c2_4 = arith.constant 2 : index
    %32 = arith.index_cast %25 : i32 to index
    %c0_5 = arith.constant 0 : index
    %33 = vector.load %arg2[%c2_4, %32, %c0_5] : memref<3x8x512xf32, #tpu.memory_space<vmem>>, vector<1x8x512xf32>
    %34 = vector.shape_cast %33 : vector<1x8x512xf32> to vector<8x512xf32>
    %35 = vector.broadcast %0 : f32 to vector<8x512xf32>
    %36 = arith.mulf %35, %28 : vector<8x512xf32>
    %37 = vector.broadcast %1 : f32 to vector<8x512xf32>
    %38 = arith.mulf %37, %31 : vector<8x512xf32>
    %39 = arith.addf %36, %38 : vector<8x512xf32>
    %40 = vector.broadcast %2 : f32 to vector<8x512xf32>
    %41 = arith.mulf %40, %34 : vector<8x512xf32>
    %42 = arith.addf %39, %41 : vector<8x512xf32>
    %43 = vector.broadcast %3 : f32 to vector<8x512xf32>
    %44 = arith.addf %42, %43 : vector<8x512xf32>
    %45 = vector.broadcast %23 : f32 to vector<8x512xf32>
    %46 = arith.maximumf %44, %45 : vector<8x512xf32>
    %47 = vector.broadcast %4 : f32 to vector<8x512xf32>
    %48 = arith.mulf %47, %28 : vector<8x512xf32>
    %49 = vector.broadcast %5 : f32 to vector<8x512xf32>
    %50 = arith.mulf %49, %31 : vector<8x512xf32>
    %51 = arith.addf %48, %50 : vector<8x512xf32>
    %52 = vector.broadcast %6 : f32 to vector<8x512xf32>
    %53 = arith.mulf %52, %34 : vector<8x512xf32>
    %54 = arith.addf %51, %53 : vector<8x512xf32>
    %55 = vector.broadcast %13 : f32 to vector<8x512xf32>
    %56 = arith.mulf %55, %46 : vector<8x512xf32>
    %57 = arith.addf %54, %56 : vector<8x512xf32>
    %58 = vector.broadcast %16 : f32 to vector<8x512xf32>
    %59 = arith.addf %57, %58 : vector<8x512xf32>
    %60 = vector.broadcast %7 : f32 to vector<8x512xf32>
    %61 = arith.mulf %60, %28 : vector<8x512xf32>
    %62 = vector.broadcast %8 : f32 to vector<8x512xf32>
    %63 = arith.mulf %62, %31 : vector<8x512xf32>
    %64 = arith.addf %61, %63 : vector<8x512xf32>
    %65 = vector.broadcast %9 : f32 to vector<8x512xf32>
    %66 = arith.mulf %65, %34 : vector<8x512xf32>
    %67 = arith.addf %64, %66 : vector<8x512xf32>
    %68 = vector.broadcast %14 : f32 to vector<8x512xf32>
    %69 = arith.mulf %68, %46 : vector<8x512xf32>
    %70 = arith.addf %67, %69 : vector<8x512xf32>
    %71 = vector.broadcast %17 : f32 to vector<8x512xf32>
    %72 = arith.addf %70, %71 : vector<8x512xf32>
    %73 = vector.broadcast %10 : f32 to vector<8x512xf32>
    %74 = arith.mulf %73, %28 : vector<8x512xf32>
    %75 = vector.broadcast %11 : f32 to vector<8x512xf32>
    %76 = arith.mulf %75, %31 : vector<8x512xf32>
    %77 = arith.addf %74, %76 : vector<8x512xf32>
    %78 = vector.broadcast %12 : f32 to vector<8x512xf32>
    %79 = arith.mulf %78, %34 : vector<8x512xf32>
    %80 = arith.addf %77, %79 : vector<8x512xf32>
    %81 = vector.broadcast %15 : f32 to vector<8x512xf32>
    %82 = arith.mulf %81, %46 : vector<8x512xf32>
    %83 = arith.addf %80, %82 : vector<8x512xf32>
    %84 = vector.broadcast %18 : f32 to vector<8x512xf32>
    %85 = arith.addf %83, %84 : vector<8x512xf32>
    %cst = arith.constant 0.000000e+00 : f32
    %86 = vector.broadcast %cst : f32 to vector<8x512xf32>
    %87 = arith.cmpf oge, %85, %86 : vector<8x512xf32>
    %cst_6 = arith.constant 0.000000e+00 : f32
    %88 = vector.broadcast %cst_6 : f32 to vector<8x512xf32>
    %89 = arith.subf %88, %59 : vector<8x512xf32>
    %90 = arith.select %87, %59, %89 : vector<8x512xi1>, vector<8x512xf32>
    %cst_7 = arith.constant 0.000000e+00 : f32
    %91 = vector.broadcast %cst_7 : f32 to vector<8x512xf32>
    %92 = arith.subf %91, %72 : vector<8x512xf32>
    %93 = arith.select %87, %72, %92 : vector<8x512xi1>, vector<8x512xf32>
    %94 = math.absf %85 : vector<8x512xf32>
    %95 = vector.broadcast %19 : f32 to vector<8x512xf32>
    %96 = arith.mulf %95, %94 : vector<8x512xf32>
    %97 = arith.cmpf oge, %90, %96 : vector<8x512xf32>
    %98 = vector.broadcast %21 : f32 to vector<8x512xf32>
    %99 = arith.mulf %98, %94 : vector<8x512xf32>
    %100 = arith.cmpf ole, %90, %99 : vector<8x512xf32>
    %101 = arith.andi %97, %100 : vector<8x512xi1>
    %102 = vector.broadcast %20 : f32 to vector<8x512xf32>
    %103 = arith.mulf %102, %94 : vector<8x512xf32>
    %104 = arith.cmpf oge, %93, %103 : vector<8x512xf32>
    %105 = arith.andi %101, %104 : vector<8x512xi1>
    %106 = vector.broadcast %22 : f32 to vector<8x512xf32>
    %107 = arith.mulf %106, %94 : vector<8x512xf32>
    %108 = arith.cmpf ole, %93, %107 : vector<8x512xf32>
    %109 = arith.andi %105, %108 : vector<8x512xi1>
    %110 = arith.extui %109 : vector<8x512xi1> to vector<8x512xi32>
    %111 = arith.sitofp %110 : vector<8x512xi32> to vector<8x512xf32>
    %112 = arith.index_cast %25 : i32 to index
    %c0_8 = arith.constant 0 : index
    %113 = vector.load %arg3[%112, %c0_8] : memref<8x512xf32, #tpu.memory_space<vmem>>, vector<8x512xf32>
    tpu.vector_store %arg3[%112, %c0_8], %111 {strides = array<i32>} : memref<8x512xf32, #tpu.memory_space<vmem>>, vector<8x512xf32>,
    %c1_i32 = arith.constant 1 : i32
    return
  }
  func.func @transform_0(%arg0: i32) -> i32 {
    %c0_i32 = arith.constant 0 : i32
    %c0_i32_0 = arith.constant 0 : i32
    return %c0_i32 : i32
  }
  func.func @transform_1(%arg0: i32) -> (i32, i32, i32) {
    %c0_i32 = arith.constant 0 : i32
    %c0_i32_0 = arith.constant 0 : i32
    %c0_i32_1 = arith.constant 0 : i32
    return %c0_i32, %arg0, %c0_i32_0 : i32, i32, i32
  }
  func.func @transform_2(%arg0: i32) -> (i32, i32) {
    %c0_i32 = arith.constant 0 : i32
    %c0_i32_0 = arith.constant 0 : i32
    return %arg0, %c0_i32 : i32, i32
  }
}

</mosaic_0001>

<bundles_post_ra>
// kernel: tpu_custom_call.1
= control target key start
LH: loop header
LB: loop body
LE: loop exit
PB: predicated region body
PF: predicated region fallthrough
CT: control target
= control target key end

     0   :  { %7 = vsyncpa [#allocation5], 0  ;;  %s697_s0 = inlined_call_operand.hbm [shape: f32[24], index: 0, kind: input, shape index: {}]   ;;  %s698_s1 = inlined_call_operand.hbm [shape: f32[3,8,512], index: 1, kind: input, shape index: {}]   ;;  %s699_s2 = inlined_call_operand.hbm [shape: f32[8,512], index: 2, kind: output, shape index: {}]  }
   0x1   :  { %8 = vsyncpa [#allocation3], 0 }
   0x2   :  { %9 = vsyncpa [#allocation4], 0  ;;  %s363_s11 = scalar_lea.hbm %s697_s0, 16 }
   0x3   :  { %p364_p0 = scmp.ne.s32.totalorder %s697_s0, %s363_s11  ;;  %p367_p1 = scmp.lt.u32.totalorder %s363_s11, %s697_s0 }
   0x5   :  { %p369_p2 = pnand %p367_p1, %p364_p0 }
   0x7   :  { %372 = shalt.err (!%p369_p2)
}
   0x8   :  { %s423_s16 = smov [#allocation2]   ;;  %s424_s19 = smov [#allocation6]  }
   0x9   :  { %17 = dma.hbm_to_smem %s697_s0, 16, %s423_s16, [#allocation5]  }
   0xa   :  { %s23_s20 = sshll.u32 %s424_s19, 4  ;;  %s373_s23 = scalar_lea.hbm %s698_s1, 1536  ;;  %s24_s20 = int_to_ptr.vmem [resolvable:$true] %s23_s20 }
   0xb   :  { %p374_p3 = scmp.ne.s32.totalorder %s698_s1, %s373_s23  ;;  %p377_p4 = scmp.lt.u32.totalorder %s373_s23, %s698_s1 }
   0xd   :  { %p379_p5 = pnand %p377_p4, %p374_p3 }
   0xf   :  { %382 = shalt.err (!%p379_p5)
}
  0x10   :  { %s383_s28 = scalar_lea.vmem %s24_s20, 1536  ;;  %p388_p7 = scmp.lt.s32.totalorder %s24_s20, %s24_s20 }
  0x11   :  { %p384_p6 = scmp.ne.s32.totalorder %s24_s20, %s383_s28  ;;  %p389_p8 = scmp.lt.s32.totalorder %s383_s28, %s383_s28 }
  0x13   :  { %p390_p9 = por %p389_p8, %p388_p7 }
  0x15   :  { %p391_p10 = pnand %p390_p9, %p384_p6 }
  0x17   :  { %394 = shalt.err (!%p391_p10)
}
  0x18   :  { %s425_s0 = smov 512   ;;  %s426_s29 = smov 32  }
  0x19   :  { %29 = dma.hbm_to_vmem [thread:$0]  %s698_s1, 1536, %s24_s20, [#allocation3], %s425_s0, %s425_s0, %s426_s29  }
  0x1a   :  { %417 = dma.done.wait [#allocation5], 16  }
  0x1b   :  { %418 = vsyncadd [#allocation5], 4294967280 }
  0x1c   :  { %419 = dma.done.wait [#allocation3], 1536  }
  0x1d   :  { %420 = vsyncadd [#allocation3], 4294965760 }
  0x1e   :  { %36 = sfence }
  0x1f   :  { %s37_s4 = sld [smem:[#allocation2]]  ;;  %s330_s5 = sld [smem:[#allocation2 + $0x1]]  ;;  %v64_v0 = vld [vmem:[#allocation6] sm:$0xff]  ;;  %v480_v3 = vld [vmem:[#allocation6 + $0x8] sm:$0xff] }
  0x20   :  { %s331_s6 = sld [smem:[#allocation2 + $0x2]]  ;;  %s332_s7 = sld [smem:[#allocation2 + $0x3]]  ;;  %v71_v1 = vld [vmem:[#allocation6 + $0x20] sm:$0xff]  ;;  %v72_v38 = vld [vmem:[#allocation6 + $0x28] sm:$0xff] }
  0x21   :  { %s333_s8 = sld [smem:[#allocation2 + $0x4]]  ;;  %s334_s9 = sld [smem:[#allocation2 + $0x5]]  ;;  %v78_v2 = vld [vmem:[#allocation6 + $0x40] sm:$0xff]  ;;  %v79_v43 = vld [vmem:[#allocation6 + $0x48] sm:$0xff] }
  0x22   :  { %s468_s10 = sld [smem:[#allocation2 + $0x6]]  ;;  %s470_s11 = sld [smem:[#allocation2 + $0x7]] }
  0x23   :  { %s472_s12 = sld [smem:[#allocation2 + $0x8]]  ;;  %s474_s13 = sld [smem:[#allocation2 + $0x9]] }
  0x24   :  { %s476_s1 = sld [smem:[#allocation2 + $0xa]]  ;;  %s478_s14 = sld [smem:[#allocation2 + $0xb]] }
  0x25   :  { %s482_s15 = sld [smem:[#allocation2 + $0xc]]  ;;  %s484_s16 = sld [smem:[#allocation2 + $0xd]]  ;;  %v486_v4 = vstv %s37_s4  ;;  %v488_v5 = vstv %s330_s5 }
  0x26   :  { %s490_s17 = sld [smem:[#allocation2 + $0xe]]  ;;  %s492_s18 = sld [smem:[#allocation2 + $0xf]]  ;;  %v83_v6 = vmul.f32 %v486_v4, %v64_v0  ;;  %v88_v7 = vmul.f32 %v488_v5, %v71_v1  ;;  %v496_v8 = vstv %s331_s6  ;;  %v498_v9 = vstv %s332_s7 }
  0x27   :  { %s500_s19 = sld [smem:[#allocation2 + $0x10]]  ;;  %s502_s20 = sld [smem:[#allocation2 + $0x11]]  ;;  %v97_v10 = vmul.f32 %v496_v8, %v78_v2  ;;  %v505_v11 = vstv %s333_s8  ;;  %v507_v12 = vstv %s334_s9  ;;  %v84_v13 = vmul.f32 %v486_v4, %v480_v3 }
  0x28   :  { %s511_s21 = sld [smem:[#allocation2 + $0x12]]  ;;  %s513_s22 = sld [smem:[#allocation2 + $0x13]]  ;;  %v92_v14 = vadd.f32 %v88_v7, %v83_v6  ;;  %v116_v15 = vmul.f32 %v505_v11, %v64_v0  ;;  %v121_v16 = vmul.f32 %v507_v12, %v71_v1  ;;  %v518_v17 = vstv %s468_s10 }
  0x29   :  { %s520_s23 = sld [smem:[#allocation2 + $0x14]]  ;;  %s522_s24 = sld [smem:[#allocation2 + $0x15]]  ;;  %v130_v18 = vmul.f32 %v518_v17, %v78_v2  ;;  %v526_v19 = vstv %s470_s11  ;;  %v529_v20 = vstv %s472_s12  ;;  %v532_v21 = vstv %s474_s13 }
  0x2a   :  { %s534_s25 = sld [smem:[#allocation2 + $0x16]]  ;;  %s352_s26 = sld [smem:[#allocation2 + $0x17]]  ;;  %v101_v22 = vadd.f32 %v97_v10, %v92_v14  ;;  %v125_v23 = vadd.f32 %v121_v16, %v116_v15  ;;  %v153_v24 = vmul.f32 %v526_v19, %v64_v0  ;;  %v158_v25 = vmul.f32 %v529_v20, %v71_v1  ;;  %v600_v15 = vld [vmem:[#allocation6 + $0x10] sm:$0xff] }
  0x2b   :  { %v539_v26 = vstv %s484_s16  ;;  %v167_v27 = vmul.f32 %v532_v21, %v78_v2  ;;  %v543_v28 = vstv %s476_s1  ;;  %v546_v29 = vstv %s478_s14  ;;  %v602_v16 = vld [vmem:[#allocation6 + $0x30] sm:$0xff]  ;;  %s428_s27 = smov [#allocation7]  }
  0x2c   :  { %v106_v30 = vadd.f32 %v498_v9, %v101_v22  ;;  %v134_v31 = vadd.f32 %v130_v18, %v125_v23  ;;  %v162_v32 = vadd.f32 %v158_v25, %v153_v24  ;;  %v550_v33 = vstv %s490_s17  ;;  %s318_s28 = sshll.u32 %s428_s27, 4  ;;  %s319_s28 = int_to_ptr.vmem [resolvable:$true] %s318_s28 }
  0x2d   :  { %v553_v34 = vstv %s500_s19  ;;  %v556_v35 = vstv %s502_s20  ;;  %v190_v36 = vmul.f32 %v543_v28, %v64_v0  ;;  %v195_v37 = vmul.f32 %v546_v29, %v71_v1  ;;  %s395_s0 = scalar_lea.vmem %s319_s28, 512  ;;  %p400_p12 = scmp.lt.s32.totalorder %s319_s28, %s319_s28 }
  0x2e   :  { %v171_v39 = vadd.f32 %v167_v27, %v162_v32  ;;  %v561_v40 = vstv %s482_s15  ;;  %v564_v41 = vstv %s492_s18  ;;  %v567_v42 = vstv %s511_s21  ;;  %p396_p11 = scmp.ne.s32.totalorder %s319_s28, %s395_s0  ;;  %p401_p13 = scmp.lt.s32.totalorder %s395_s0, %s395_s0 }
  0x2f   :  { %v199_v44 = vadd.f32 %v195_v37, %v190_v36  ;;  %v204_v45 = vmul.f32 %v561_v40, %v78_v2  ;;  %v571_v46 = vstv %s513_s22  ;;  %v574_v47 = vstv %s522_s24 }
  0x30   :  { %v576_v48 = vstv %s352_s26  ;;  %v579_v49 = vstv %s520_s23  ;;  %v582_v50 = vstv %s534_s25  ;;  %v89_v51 = vmul.f32 %v488_v5, %v72_v38  ;;  %p402_p0 = por %p401_p13, %p400_p12 }
  0x31   :  { %v111_v52 = vmax.f32 %v106_v30, %v576_v48  ;;  %v208_v53 = vadd.f32 %v204_v45, %v199_v44  ;;  %v98_v54 = vmul.f32 %v496_v8, %v79_v43  ;;  %v117_v55 = vmul.f32 %v505_v11, %v480_v3 }
  0x32   :  { %v93_v56 = vadd.f32 %v89_v51, %v84_v13  ;;  %v122_v57 = vmul.f32 %v507_v12, %v72_v38  ;;  %v131_v58 = vmul.f32 %v518_v17, %v79_v43  ;;  %v154_v59 = vmul.f32 %v526_v19, %v480_v3  ;;  %p403_p1 = pnand %p402_p0, %p396_p11 }
  0x33   :  { %v139_v60 = vmul.f32 %v539_v26, %v111_v52  ;;  %v176_v61 = vmul.f32 %v550_v33, %v111_v52  ;;  %v213_v62 = vmul.f32 %v564_v41, %v111_v52  ;;  %v159_v63 = vmul.f32 %v529_v20, %v72_v38 }
  0x34   :  { %v102_v0 = vadd.f32 %v98_v54, %v93_v56  ;;  %v126_v1 = vadd.f32 %v122_v57, %v117_v55  ;;  %v168_v2 = vmul.f32 %v532_v21, %v79_v43  ;;  %v191_v6 = vmul.f32 %v543_v28, %v480_v3 }
  0x35   :  { %v143_v7 = vadd.f32 %v139_v60, %v134_v31  ;;  %v180_v10 = vadd.f32 %v176_v61, %v171_v39  ;;  %v217_v13 = vadd.f32 %v213_v62, %v208_v53  ;;  %v163_v14 = vadd.f32 %v159_v63, %v154_v59  ;;  %v80_v61 = vld [vmem:[#allocation6 + $0x50] sm:$0xff] }
  0x36   :  { %v107_v18 = vadd.f32 %v498_v9, %v102_v0  ;;  %v135_v22 = vadd.f32 %v131_v58, %v126_v1  ;;  %v196_v23 = vmul.f32 %v546_v29, %v72_v38  ;;  %v205_v24 = vmul.f32 %v561_v40, %v79_v43 }
  0x37   :  { %v148_v25 = vadd.f32 %v553_v34, %v143_v7  ;;  %v185_v27 = vadd.f32 %v556_v35, %v180_v10  ;;  %v222_v3 = vadd.f32 %v567_v42, %v217_v13  ;;  %v172_v30 = vadd.f32 %v168_v2, %v163_v14 }
  0x38   :  { %v112_v31 = vmax.f32 %v107_v18, %v576_v48  ;;  %v200_v32 = vadd.f32 %v196_v23, %v191_v6  ;;  %v85_v36 = vmul.f32 %v486_v4, %v600_v15  ;;  %v90_v37 = vmul.f32 %v488_v5, %v602_v16 }
  0x39   :  { %vm226_vm0 = vcmp.ge.f32.partialorder %v222_v3, 0.0  ;;  %v230_v38 = vsub.f32 0.0, %v148_v25  ;;  %v238_v39 = vsub.f32 0.0, %v185_v27  ;;  %v246_v43 = vand.u32 2147483647, %v222_v3 }
  0x3a   :  { %v140_v44 = vmul.f32 %v539_v26, %v112_v31  ;;  %v177_v45 = vmul.f32 %v550_v33, %v112_v31  ;;  %v209_v51 = vadd.f32 %v205_v24, %v200_v32  ;;  %v214_v52 = vmul.f32 %v564_v41, %v112_v31 }
  0x3b   :  { %v234_v53 = vsel %vm226_vm0, %v148_v25, %v230_v38  ;;  %v242_v54 = vsel %vm226_vm0, %v185_v27, %v238_v39  ;;  %v251_v55 = vmul.f32 %v571_v46, %v246_v43  ;;  %v260_v56 = vmul.f32 %v574_v47, %v246_v43 }
  0x3c   :  { %v273_v57 = vmul.f32 %v579_v49, %v246_v43  ;;  %v286_v58 = vmul.f32 %v582_v50, %v246_v43  ;;  %v144_v59 = vadd.f32 %v140_v44, %v135_v22  ;;  %v181_v60 = vadd.f32 %v177_v45, %v172_v30 }
  0x3d   :  { %vm255_vm1 = vcmp.ge.f32.partialorder %v234_v53, %v251_v55  ;;  %vm264_vm2 = vcmp.le.f32.partialorder %v234_v53, %v260_v56  ;;  %v218_v62 = vadd.f32 %v214_v52, %v209_v51  ;;  %v94_v63 = vadd.f32 %v90_v37, %v85_v36  ;;  %v67_v52 = vld [vmem:[#allocation6 + $0x18] sm:$0xff] }
  0x3e   :  { %vm268_vm3 = vmand %vm255_vm1, %vm264_vm2  ;;  %vm277_vm4 = vcmp.ge.f32.partialorder %v242_v54, %v273_v57  ;;  %vm290_vm5 = vcmp.le.f32.partialorder %v242_v54, %v286_v58  ;;  %v149_v0 = vadd.f32 %v553_v34, %v144_v59  ;;  %v186_v1 = vadd.f32 %v556_v35, %v181_v60  ;;  %v74_v53 = vld [vmem:[#allocation6 + $0x38] sm:$0xff] }
  0x3f   :  { %vm281_vm6 = vmand %vm268_vm3, %vm277_vm4  ;;  %v223_v2 = vadd.f32 %v567_v42, %v218_v62  ;;  %v99_v6 = vmul.f32 %v496_v8, %v80_v61  ;;  %v118_v7 = vmul.f32 %v505_v11, %v600_v15  ;;  %v123_v10 = vmul.f32 %v507_v12, %v602_v16  ;;  %v81_v54 = vld [vmem:[#allocation6 + $0x58] sm:$0xff] }
  0x40   :  { %vm294_vm7 = vmand %vm281_vm6, %vm290_vm5  ;;  %v231_v13 = vsub.f32 0.0, %v149_v0  ;;  %v239_v14 = vsub.f32 0.0, %v186_v1  ;;  %v132_v18 = vmul.f32 %v518_v17, %v80_v61  ;;  %v155_v22 = vmul.f32 %v526_v19, %v600_v15 }
  0x41   :  { %v427_v23 = vmov 0.0   ;;  %vm227_vm8 = vcmp.ge.f32.partialorder %v223_v2, 0.0  ;;  %v247_v25 = vand.u32 2147483647, %v223_v2  ;;  %v103_v27 = vadd.f32 %v99_v6, %v94_v63 }
  0x42   :  { %v353_v24 = vsel %vm294_vm7, 1.0, %v427_v23  ;;  %v235_v3 = vsel %vm227_vm8, %v149_v0, %v231_v13  ;;  %v243_v30 = vsel %vm227_vm8, %v186_v1, %v239_v14  ;;  %v127_v31 = vadd.f32 %v123_v10, %v118_v7 }
  0x43   :  { %308 = vst [vmem:[#allocation7] sm:$0xff] %v353_v24  ;;  %v160_v32 = vmul.f32 %v529_v20, %v602_v16  ;;  %v252_v36 = vmul.f32 %v571_v46, %v247_v25  ;;  %v261_v37 = vmul.f32 %v574_v47, %v247_v25  ;;  %v274_v38 = vmul.f32 %v579_v49, %v247_v25 }
  0x44   :  { %v287_v39 = vmul.f32 %v582_v50, %v247_v25  ;;  %v108_v43 = vadd.f32 %v498_v9, %v103_v27  ;;  %v136_v44 = vadd.f32 %v132_v18, %v127_v31  ;;  %v169_v51 = vmul.f32 %v532_v21, %v80_v61 }
  0x45   :  { %v164_v45 = vadd.f32 %v160_v32, %v155_v22  ;;  %vm256_vm9 = vcmp.ge.f32.partialorder %v235_v3, %v252_v36  ;;  %vm265_vm10 = vcmp.le.f32.partialorder %v235_v3, %v261_v37  ;;  %vm278_vm11 = vcmp.ge.f32.partialorder %v243_v30, %v274_v38 }
  0x46   :  { %vm291_vm12 = vcmp.le.f32.partialorder %v243_v30, %v287_v39  ;;  %vm269_vm13 = vmand %vm256_vm9, %vm265_vm10  ;;  %v113_v55 = vmax.f32 %v108_v43, %v576_v48  ;;  %v192_v57 = vmul.f32 %v543_v28, %v600_v15  ;;  %v197_v58 = vmul.f32 %v546_v29, %v602_v16 }
  0x47   :  { %v173_v56 = vadd.f32 %v169_v51, %v164_v45  ;;  %vm282_vm14 = vmand %vm269_vm13, %vm278_vm11  ;;  %v206_v59 = vmul.f32 %v561_v40, %v80_v61  ;;  %v86_v60 = vmul.f32 %v486_v4, %v67_v52  ;;  %v91_v62 = vmul.f32 %v488_v5, %v74_v53 }
  0x48   :  { %v100_v63 = vmul.f32 %v496_v8, %v81_v54  ;;  %vm295_vm15 = vmand %vm282_vm14, %vm291_vm12  ;;  %v141_v0 = vmul.f32 %v539_v26, %v113_v55  ;;  %v178_v1 = vmul.f32 %v550_v33, %v113_v55  ;;  %v201_v2 = vadd.f32 %v197_v58, %v192_v57 }
  0x49   :  { %v215_v15 = vmul.f32 %v564_v41, %v113_v55  ;;  %v354_v6 = vsel %vm295_vm15, 1.0, %v427_v23  ;;  %v95_v16 = vadd.f32 %v91_v62, %v86_v60  ;;  %v119_v7 = vmul.f32 %v505_v11, %v67_v52 }
  0x4a   :  { %v124_v61 = vmul.f32 %v507_v12, %v74_v53  ;;  %309 = vst [vmem:[#allocation7 + $0x8] sm:$0xff] %v354_v6  ;;  %v145_v4 = vadd.f32 %v141_v0, %v136_v44  ;;  %v182_v5 = vadd.f32 %v178_v1, %v173_v56  ;;  %v210_v10 = vadd.f32 %v206_v59, %v201_v2 }
  0x4b   :  { %v133_v8 = vmul.f32 %v518_v17, %v81_v54  ;;  %v104_v13 = vadd.f32 %v100_v63, %v95_v16  ;;  %v156_v18 = vmul.f32 %v526_v19, %v67_v52  ;;  %v161_v22 = vmul.f32 %v529_v20, %v74_v53 }
  0x4c   :  { %v128_v14 = vadd.f32 %v124_v61, %v119_v7  ;;  %v150_v24 = vadd.f32 %v553_v34, %v145_v4  ;;  %v187_v25 = vadd.f32 %v556_v35, %v182_v5  ;;  %v219_v27 = vadd.f32 %v215_v15, %v210_v10 }
  0x4d   :  { %v170_v11 = vmul.f32 %v532_v21, %v81_v54  ;;  %v109_v12 = vadd.f32 %v498_v9, %v104_v13  ;;  %v165_v3 = vadd.f32 %v161_v22, %v156_v18  ;;  %v193_v30 = vmul.f32 %v543_v28, %v67_v52 }
  0x4e   :  { %v224_v17 = vadd.f32 %v567_v42, %v219_v27  ;;  %v232_v31 = vsub.f32 0.0, %v150_v24  ;;  %v240_v32 = vsub.f32 0.0, %v187_v25  ;;  %v198_v19 = vmul.f32 %v546_v29, %v74_v53 }
  0x4f   :  { %v114_v20 = vmax.f32 %v109_v12, %v576_v48  ;;  %v137_v36 = vadd.f32 %v133_v8, %v128_v14  ;;  %v174_v37 = vadd.f32 %v170_v11, %v165_v3  ;;  %v207_v38 = vmul.f32 %v561_v40, %v81_v54 }
  0x50   :  { %vm228_vm0 = vcmp.ge.f32.partialorder %v224_v17, 0.0  ;;  %v248_v39 = vand.u32 2147483647, %v224_v17  ;;  %v202_v21 = vadd.f32 %v198_v19, %v193_v30 }
  0x51   :  { %v236_v43 = vsel %vm228_vm0, %v150_v24, %v232_v31  ;;  %v244_v9 = vsel %vm228_vm0, %v187_v25, %v240_v32  ;;  %v142_v44 = vmul.f32 %v539_v26, %v114_v20  ;;  %v179_v28 = vmul.f32 %v550_v33, %v114_v20 }
  0x52   :  { %v253_v45 = vmul.f32 %v571_v46, %v248_v39  ;;  %v262_v51 = vmul.f32 %v574_v47, %v248_v39  ;;  %v275_v29 = vmul.f32 %v579_v49, %v248_v39  ;;  %v288_v48 = vmul.f32 %v582_v50, %v248_v39 }
  0x53   :  { %v146_v52 = vadd.f32 %v142_v44, %v137_v36  ;;  %v183_v53 = vadd.f32 %v179_v28, %v174_v37  ;;  %v211_v40 = vadd.f32 %v207_v38, %v202_v21  ;;  %v216_v54 = vmul.f32 %v564_v41, %v114_v20 }
  0x54   :  { %vm257_vm1 = vcmp.ge.f32.partialorder %v236_v43, %v253_v45  ;;  %vm266_vm2 = vcmp.le.f32.partialorder %v236_v43, %v262_v51  ;;  %vm279_vm3 = vcmp.ge.f32.partialorder %v244_v9, %v275_v29  ;;  %vm292_vm4 = vcmp.le.f32.partialorder %v244_v9, %v288_v48 }
  0x55   :  { %vm270_vm5 = vmand %vm257_vm1, %vm266_vm2  ;;  %v151_v26 = vadd.f32 %v553_v34, %v146_v52  ;;  %v188_v33 = vadd.f32 %v556_v35, %v183_v53  ;;  %v220_v55 = vadd.f32 %v216_v54, %v211_v40 }
  0x56   :  { %vm283_vm6 = vmand %vm270_vm5, %vm279_vm3 }
  0x57   :  { %vm296_vm7 = vmand %vm283_vm6, %vm292_vm4  ;;  %v225_v56 = vadd.f32 %v567_v42, %v220_v55  ;;  %v233_v57 = vsub.f32 0.0, %v151_v26  ;;  %v241_v58 = vsub.f32 0.0, %v188_v33 }
  0x58   :  { %v355_v59 = vsel %vm296_vm7, 1.0, %v427_v23 }
  0x59   :  { %310 = vst [vmem:[#allocation7 + $0x10] sm:$0xff] %v355_v59  ;;  %vm229_vm8 = vcmp.ge.f32.partialorder %v225_v56, 0.0  ;;  %v249_v41 = vand.u32 2147483647, %v225_v56 }
  0x5a   :  { %v237_v60 = vsel %vm229_vm8, %v151_v26, %v233_v57  ;;  %v245_v62 = vsel %vm229_vm8, %v188_v33, %v241_v58 }
  0x5b   :  { %v254_v63 = vmul.f32 %v571_v46, %v249_v41  ;;  %v263_v34 = vmul.f32 %v574_v47, %v249_v41  ;;  %v276_v35 = vmul.f32 %v579_v49, %v249_v41  ;;  %v289_v0 = vmul.f32 %v582_v50, %v249_v41 }
  0x5d   :  { %vm258_vm9 = vcmp.ge.f32.partialorder %v237_v60, %v254_v63  ;;  %vm267_vm10 = vcmp.le.f32.partialorder %v237_v60, %v263_v34  ;;  %vm280_vm11 = vcmp.ge.f32.partialorder %v245_v62, %v276_v35  ;;  %vm293_vm12 = vcmp.le.f32.partialorder %v245_v62, %v289_v0 }
  0x5e   :  { %vm271_vm13 = vmand %vm258_vm9, %vm267_vm10 }
  0x5f   :  { %vm284_vm14 = vmand %vm271_vm13, %vm280_vm11 }
  0x60   :  { %vm297_vm15 = vmand %vm284_vm14, %vm293_vm12 }
  0x61   :  { %v356_v42 = vsel %vm297_vm15, 1.0, %v427_v23 }
  0x62   :  { %311 = vst [vmem:[#allocation7 + $0x18] sm:$0xff] %v356_v42 }
  0x63   :  { %406 = shalt.err (!%p403_p1)
}
  0x64   :  { %s407_s3 = scalar_lea.hbm %s699_s2, 512 }
  0x65   :  { %p408_p2 = scmp.ne.s32.totalorder %s699_s2, %s407_s3  ;;  %p411_p3 = scmp.lt.u32.totalorder %s407_s3, %s699_s2 }
  0x67   :  { %p413_p4 = pnand %p411_p3, %p408_p2 }
  0x69   :  { %416 = shalt.err (!%p413_p4)
}
  0x6a   :  { %321 = dma.vmem_to_hbm [thread:$0]  %s319_s28, 512, %s699_s2, [#allocation4]  }
  0x6b   :  { %421 = dma.done.wait [#allocation4], 512  }
  0x6c   :  { %422 = vsyncadd [#allocation4], 4294966784 }
  0x6d   :  { %325 = vsyncpa [#allocation3], 1 }
  0x6e   :  { %326 = vsyncpa [#allocation4], 1 }
  0x6f   :  { %327 = vsyncpa [#allocation5], 1 }

</bundles_post_ra>
